<compile_context>
chip_gen: v5e
topology: v5e:2x2
jax: 0.10.0
libtpu: 0.0.40
codegen_flags: <defaults>
</compile_context>

<pallas_src>
import functools

import jax
import jax.numpy as jnp
from jax.experimental import pallas as pl
from jax.experimental.pallas import tpu as pltpu


def _round_up(x, m):
    return ((x + m - 1) // m) * m


def _cdiv(a, b):
    return -(-a // b)


def _cnn_kernel(x_ref, w_ref, b_ref, o_ref, *, c_in, ck_pad, l_out):
    """One batch-tile of: in-VMEM unfold -> deep MXU conv -> running time-max -> +bias -> ReLU.

    x_ref: (TB, L_flat)      mxu dtype  flattened channels-last activations (row = one word)
    w_ref: (CK_pad, N_pad)   mxu dtype  flattened conv weights; rows >= C_in*K are zero
    b_ref: (1, N_pad)        f32        bias
    o_ref: (TB, N_pad)       f32        per-word channel maxima (lane-dense output)
    """
    w = w_ref[...]                                              # resident weights
    for t in range(l_out):                                      # static unroll, small L_out
        # Lane window for output position t: elements (t+dt)*C_in + c, dt < K, plus a few
        # extra real lanes that only ever hit zero-padded weight rows (exact).
        a = x_ref[:, pl.ds(t * c_in, ck_pad)]                   # (TB, CK_pad)
        r = jnp.dot(a, w, preferred_element_type=jnp.float32)   # (TB, N_pad) f32
        if t == 0:
            o_ref[...] = r
        else:
            o_ref[...] = jnp.maximum(o_ref[...], r)
    # ReLU(x + b) is monotone in x => bias + ReLU commute with the time-max (exact).
    o_ref[...] = jnp.maximum(o_ref[...] + b_ref[...], 0.0).astype(o_ref.dtype)


def cnn_forward(x, weight, bias, *, batch_tile=512, mxu_dtype=jnp.bfloat16,
                vmem_budget_bytes=40 * 2**20):
    """Char-CNN forward matching nn.Conv1d + ReLU + max over dim=2.

    x:      (B, e_char, m_word)  float32  (PyTorch NCL layout)
    weight: (e_word, e_char, K)  float32
    bias:   (e_word,)            float32
    returns (B, e_word)          float32
    """
    B, C_in, L = x.shape
    C_out, _, K = weight.shape
    L_out = L - K + 1
    CK = C_in * K

    in_itemsize = jnp.dtype(mxu_dtype).itemsize
    CK_pad = _round_up(CK, 128)          # deep, fully-packed MXU contraction
    N_pad = _round_up(C_out, 128)        # lane-dense output stores

    # Lane extent per word: enough for the widest slice (t = L_out-1), rounded to 128.
    L_flat = _round_up((L_out - 1) * C_in + CK_pad, 128)

    # ---- tile sizing ----
    TB = _round_up(min(batch_tile, B), 8)
    # v7x has 2 TensorCores: make sure the "parallel" batch axis has >= 2 grid steps.
    if B > 8 and _cdiv(B, TB) < 2:
        TB = _round_up(_cdiv(B, 2), 8)

    def vmem_need(tb):
        return (2 * tb * L_flat * in_itemsize        # double-buffered activation tile
                + 2 * CK_pad * N_pad * in_itemsize   # weights (resident)
                + 2 * N_pad * 4                      # bias
                + 2 * tb * N_pad * 4                 # double-buffered output tile
                + 4 * tb * max(CK_pad, N_pad) * 4)   # in-loop temporaries / spill slack

    # Keep the working set comfortably inside v7x's 64 MiB physical VMEM (and well under
    # v5e/v6e); shrink the batch tile rather than spill.
    while TB > 8 and vmem_need(TB) > vmem_budget_bytes:
        TB = max(8, _round_up(TB // 2, 8))

    B_pad = _round_up(B, TB)
    grid = (B_pad // TB,)

    # ---- wrapper prep: cast first (halves pre-pass bytes), channels-last, flatten ----
    # Raw activations stream at ~1x their size; the K-way unfold happens in VMEM.
    x_cl = x.astype(mxu_dtype).transpose(0, 2, 1)                  # (B, L, C_in)
    x2d = x_cl.reshape(B, L * C_in)
    x2d = jnp.pad(x2d, ((0, B_pad - B), (0, L_flat - L * C_in)))   # (B_pad, L_flat)

    # Flattened weights: row dt*C_in + c <-> weight[o, c, dt]; rows >= CK are zero so the
    # extra lanes grabbed by the CK_pad-wide activation slice contribute nothing (exact).
    w2d = weight.astype(mxu_dtype).transpose(2, 1, 0).reshape(CK, C_out)
    w2d = jnp.pad(w2d, ((0, CK_pad - CK), (0, N_pad - C_out)))     # (CK_pad, N_pad)
    b2d = jnp.pad(bias.astype(jnp.float32).reshape(1, C_out),
                  ((0, 0), (0, N_pad - C_out)))                    # (1, N_pad)

    cost = pl.CostEstimate(
        flops=2 * B_pad * L_out * CK_pad * N_pad,
        transcendentals=0,
        bytes_accessed=(x2d.size * in_itemsize + w2d.size * in_itemsize
                        + b2d.size * 4 + B_pad * N_pad * 4),
    )
    vmem_limit = int(min(48 * 2**20, max(32 * 2**20, 2 * vmem_need(TB))))

    out_padded = pl.pallas_call(
        functools.partial(_cnn_kernel, c_in=C_in, ck_pad=CK_pad, l_out=L_out),
        out_shape=jax.ShapeDtypeStruct((B_pad, N_pad), jnp.float32),
        grid=grid,
        in_specs=[
            # TODO(synk): if the activation copy shows up on the critical path (most likely
            # v7x), add pipeline_mode=pl.Buffered(3) to this spec.
            pl.BlockSpec((TB, L_flat), lambda i: (i, 0)),          # activation tile
            pl.BlockSpec((CK_pad, N_pad), lambda i: (0, 0)),       # weights (resident)
            pl.BlockSpec((1, N_pad), lambda i: (0, 0)),            # bias (resident)
        ],
        out_specs=pl.BlockSpec((TB, N_pad), lambda i: (i, 0)),
        compiler_params=pltpu.CompilerParams(
            dimension_semantics=("parallel",),
            vmem_limit_bytes=vmem_limit),
        cost_estimate=cost,
    )(x2d, w2d, b2d)

    return out_padded[:B, :C_out]


def cnn_reference(x, weight, bias):
    """Pure-JAX f32 reference matching nn.Conv1d + ReLU + max over dim=2."""
    B, C_in, L = x.shape
    C_out, _, K = weight.shape
    L_out = L - K + 1
    acc = jnp.zeros((B, C_out, L_out), jnp.float32)
    for k in range(K):
        acc = acc + jnp.einsum("oc,bcl->bol", weight[:, :, k], x[:, :, k:k + L_out])
    acc = acc + bias.reshape(1, C_out, 1)
    return jnp.max(jnp.maximum(acc, 0.0), axis=2)


def _make_inputs(key, batch, e_char, m_word, e_word, kernel_size):
    kx, kw, kb = jax.random.split(key, 3)
    x = jax.random.normal(kx, (batch, e_char, m_word), dtype=jnp.float32)
    fan_in = e_char * kernel_size
    bound = 1.0 / jnp.sqrt(jnp.float32(fan_in))
    weight = jax.random.uniform(kw, (e_word, e_char, kernel_size),
                                minval=-bound, maxval=bound, dtype=jnp.float32)
    bias = jax.random.uniform(kb, (e_word,),
                              minval=-bound, maxval=bound, dtype=jnp.float32)
    return x, weight, bias


if __name__ == "__main__":
    key = jax.random.PRNGKey(0)
    k1, k2 = jax.random.split(key)

    # Test 1: toy shapes from the module's forward (bf16 MXU operands, f32 accumulate).
    batch, e_char, m_word, e_word, ksz = 2, 4, 16, 8, 5
    x, weight, bias = _make_inputs(k1, batch, e_char, m_word, e_word, ksz)
    out = jax.block_until_ready(cnn_forward(x, weight, bias))
    ref = cnn_reference(x, weight, bias)
    assert out.shape == (batch, e_word), out.shape
    assert jnp.allclose(out, ref, atol=3e-2, rtol=3e-2), (out, ref)

    # Test 2: multiple grid steps + time/channel/CK padding; f32 operands -> exact.
    batch, e_char, m_word, e_word, ksz = 20, 6, 21, 16, 5
    x, weight, bias = _make_inputs(k2, batch, e_char, m_word, e_word, ksz)
    out = jax.block_until_ready(
        cnn_forward(x, weight, bias, batch_tile=8, mxu_dtype=jnp.float32))
    ref = cnn_reference(x, weight, bias)
    assert out.shape == (batch, e_word), out.shape
    assert jnp.allclose(out, ref, atol=1e-5, rtol=1e-5), (out, ref)

    print("KERNEL_OK")
</pallas_src>

<mosaic_0001>
module attributes {stable_mosaic.version = 11 : i64} {
  func.func @_cnn_kernel(%arg0: i32, %arg1: memref<8x256xbf16, #tpu.memory_space<vmem>>, %arg2: memref<128x128xbf16, #tpu.memory_space<vmem>>, %arg3: memref<1x128xf32, #tpu.memory_space<vmem>>, %arg4: memref<8x128xf32, #tpu.memory_space<vmem>>) attributes {dimension_semantics = [#tpu.dimension_semantics<parallel>], iteration_bounds = array<i64: 1>, scalar_prefetch = 0 : i64, scratch_operands = 0 : i64, tpu.core_type = #tpu.core_type<tc>, window_params = [{transform_indices = @transform_0, window_bounds = array<i64: 8, 256>}, {pipeline_mode = #tpu.pipeline_mode<synchronous>, transform_indices = @transform_1, window_bounds = array<i64: 128, 128>}, {pipeline_mode = #tpu.pipeline_mode<synchronous>, transform_indices = @transform_2, window_bounds = array<i64: 1, 128>}, {transform_indices = @transform_3, window_bounds = array<i64: 8, 128>}]} {
    %c0 = arith.constant 0 : index
    %c0_0 = arith.constant 0 : index
    %0 = vector.load %arg2[%c0, %c0_0] : memref<128x128xbf16, #tpu.memory_space<vmem>>, vector<128x128xbf16>
    %c0_1 = arith.constant 0 : index
    %c0_2 = arith.constant 0 : index
    %1 = vector.load %arg1[%c0_1, %c0_2] : memref<8x256xbf16, #tpu.memory_space<vmem>>, vector<8x128xbf16>
    %cst = arith.constant dense<0.000000e+00> : vector<8x128xf32>
    %2 = tpu.matmul %1, %0, %cst {dimension_numbers = #tpu.dot_dimension_numbers<[1], [0], [0], [1], [0, 0, 1, 1], [], []>} : vector<8x128xbf16>, vector<128x128xbf16>, vector<8x128xf32> -> vector<8x128xf32>
    %c0_3 = arith.constant 0 : index
    %c0_4 = arith.constant 0 : index
    %3 = vector.load %arg4[%c0_3, %c0_4] : memref<8x128xf32, #tpu.memory_space<vmem>>, vector<8x128xf32>
    tpu.vector_store %arg4[%c0_3, %c0_4], %2 {strides = array<i32>} : memref<8x128xf32, #tpu.memory_space<vmem>>, vector<8x128xf32>,
    %c0_5 = arith.constant 0 : index
    %c4 = arith.constant 4 : index
    %4 = vector.load %arg1[%c0_5, %c4] : memref<8x256xbf16, #tpu.memory_space<vmem>>, vector<8x128xbf16>
    %cst_6 = arith.constant dense<0.000000e+00> : vector<8x128xf32>
    %5 = tpu.matmul %4, %0, %cst_6 {dimension_numbers = #tpu.dot_dimension_numbers<[1], [0], [0], [1], [0, 0, 1, 1], [], []>} : vector<8x128xbf16>, vector<128x128xbf16>, vector<8x128xf32> -> vector<8x128xf32>
    %c0_7 = arith.constant 0 : index
    %c0_8 = arith.constant 0 : index
    %6 = vector.load %arg4[%c0_7, %c0_8] : memref<8x128xf32, #tpu.memory_space<vmem>>, vector<8x128xf32>
    %7 = arith.maximumf %6, %5 : vector<8x128xf32>
    %c0_9 = arith.constant 0 : index
    %c0_10 = arith.constant 0 : index
    %8 = vector.load %arg4[%c0_9, %c0_10] : memref<8x128xf32, #tpu.memory_space<vmem>>, vector<8x128xf32>
    tpu.vector_store %arg4[%c0_9, %c0_10], %7 {strides = array<i32>} : memref<8x128xf32, #tpu.memory_space<vmem>>, vector<8x128xf32>,
    %c0_11 = arith.constant 0 : index
    %c8 = arith.constant 8 : index
    %9 = vector.load %arg1[%c0_11, %c8] : memref<8x256xbf16, #tpu.memory_space<vmem>>, vector<8x128xbf16>
    %cst_12 = arith.constant dense<0.000000e+00> : vector<8x128xf32>
    %10 = tpu.matmul %9, %0, %cst_12 {dimension_numbers = #tpu.dot_dimension_numbers<[1], [0], [0], [1], [0, 0, 1, 1], [], []>} : vector<8x128xbf16>, vector<128x128xbf16>, vector<8x128xf32> -> vector<8x128xf32>
    %c0_13 = arith.constant 0 : index
    %c0_14 = arith.constant 0 : index
    %11 = vector.load %arg4[%c0_13, %c0_14] : memref<8x128xf32, #tpu.memory_space<vmem>>, vector<8x128xf32>
    %12 = arith.maximumf %11, %10 : vector<8x128xf32>
    %c0_15 = arith.constant 0 : index
    %c0_16 = arith.constant 0 : index
    %13 = vector.load %arg4[%c0_15, %c0_16] : memref<8x128xf32, #tpu.memory_space<vmem>>, vector<8x128xf32>
    tpu.vector_store %arg4[%c0_15, %c0_16], %12 {strides = array<i32>} : memref<8x128xf32, #tpu.memory_space<vmem>>, vector<8x128xf32>,
    %c0_17 = arith.constant 0 : index
    %c12 = arith.constant 12 : index
    %14 = vector.load %arg1[%c0_17, %c12] : memref<8x256xbf16, #tpu.memory_space<vmem>>, vector<8x128xbf16>
    %cst_18 = arith.constant dense<0.000000e+00> : vector<8x128xf32>
    %15 = tpu.matmul %14, %0, %cst_18 {dimension_numbers = #tpu.dot_dimension_numbers<[1], [0], [0], [1], [0, 0, 1, 1], [], []>} : vector<8x128xbf16>, vector<128x128xbf16>, vector<8x128xf32> -> vector<8x128xf32>
    %c0_19 = arith.constant 0 : index
    %c0_20 = arith.constant 0 : index
    %16 = vector.load %arg4[%c0_19, %c0_20] : memref<8x128xf32, #tpu.memory_space<vmem>>, vector<8x128xf32>
    %17 = arith.maximumf %16, %15 : vector<8x128xf32>
    %c0_21 = arith.constant 0 : index
    %c0_22 = arith.constant 0 : index
    %18 = vector.load %arg4[%c0_21, %c0_22] : memref<8x128xf32, #tpu.memory_space<vmem>>, vector<8x128xf32>
    tpu.vector_store %arg4[%c0_21, %c0_22], %17 {strides = array<i32>} : memref<8x128xf32, #tpu.memory_space<vmem>>, vector<8x128xf32>,
    %c0_23 = arith.constant 0 : index
    %c16 = arith.constant 16 : index
    %19 = vector.load %arg1[%c0_23, %c16] : memref<8x256xbf16, #tpu.memory_space<vmem>>, vector<8x128xbf16>
    %cst_24 = arith.constant dense<0.000000e+00> : vector<8x128xf32>
    %20 = tpu.matmul %19, %0, %cst_24 {dimension_numbers = #tpu.dot_dimension_numbers<[1], [0], [0], [1], [0, 0, 1, 1], [], []>} : vector<8x128xbf16>, vector<128x128xbf16>, vector<8x128xf32> -> vector<8x128xf32>
    %c0_25 = arith.constant 0 : index
    %c0_26 = arith.constant 0 : index
    %21 = vector.load %arg4[%c0_25, %c0_26] : memref<8x128xf32, #tpu.memory_space<vmem>>, vector<8x128xf32>
    %22 = arith.maximumf %21, %20 : vector<8x128xf32>
    %c0_27 = arith.constant 0 : index
    %c0_28 = arith.constant 0 : index
    %23 = vector.load %arg4[%c0_27, %c0_28] : memref<8x128xf32, #tpu.memory_space<vmem>>, vector<8x128xf32>
    tpu.vector_store %arg4[%c0_27, %c0_28], %22 {strides = array<i32>} : memref<8x128xf32, #tpu.memory_space<vmem>>, vector<8x128xf32>,
    %c0_29 = arith.constant 0 : index
    %c20 = arith.constant 20 : index
    %24 = vector.load %arg1[%c0_29, %c20] : memref<8x256xbf16, #tpu.memory_space<vmem>>, vector<8x128xbf16>
    %cst_30 = arith.constant dense<0.000000e+00> : vector<8x128xf32>
    %25 = tpu.matmul %24, %0, %cst_30 {dimension_numbers = #tpu.dot_dimension_numbers<[1], [0], [0], [1], [0, 0, 1, 1], [], []>} : vector<8x128xbf16>, vector<128x128xbf16>, vector<8x128xf32> -> vector<8x128xf32>
    %c0_31 = arith.constant 0 : index
    %c0_32 = arith.constant 0 : index
    %26 = vector.load %arg4[%c0_31, %c0_32] : memref<8x128xf32, #tpu.memory_space<vmem>>, vector<8x128xf32>
    %27 = arith.maximumf %26, %25 : vector<8x128xf32>
    %c0_33 = arith.constant 0 : index
    %c0_34 = arith.constant 0 : index
    %28 = vector.load %arg4[%c0_33, %c0_34] : memref<8x128xf32, #tpu.memory_space<vmem>>, vector<8x128xf32>
    tpu.vector_store %arg4[%c0_33, %c0_34], %27 {strides = array<i32>} : memref<8x128xf32, #tpu.memory_space<vmem>>, vector<8x128xf32>,
    %c0_35 = arith.constant 0 : index
    %c24 = arith.constant 24 : index
    %29 = vector.load %arg1[%c0_35, %c24] : memref<8x256xbf16, #tpu.memory_space<vmem>>, vector<8x128xbf16>
    %cst_36 = arith.constant dense<0.000000e+00> : vector<8x128xf32>
    %30 = tpu.matmul %29, %0, %cst_36 {dimension_numbers = #tpu.dot_dimension_numbers<[1], [0], [0], [1], [0, 0, 1, 1], [], []>} : vector<8x128xbf16>, vector<128x128xbf16>, vector<8x128xf32> -> vector<8x128xf32>
    %c0_37 = arith.constant 0 : index
    %c0_38 = arith.constant 0 : index
    %31 = vector.load %arg4[%c0_37, %c0_38] : memref<8x128xf32, #tpu.memory_space<vmem>>, vector<8x128xf32>
    %32 = arith.maximumf %31, %30 : vector<8x128xf32>
    %c0_39 = arith.constant 0 : index
    %c0_40 = arith.constant 0 : index
    %33 = vector.load %arg4[%c0_39, %c0_40] : memref<8x128xf32, #tpu.memory_space<vmem>>, vector<8x128xf32>
    tpu.vector_store %arg4[%c0_39, %c0_40], %32 {strides = array<i32>} : memref<8x128xf32, #tpu.memory_space<vmem>>, vector<8x128xf32>,
    %c0_41 = arith.constant 0 : index
    %c28 = arith.constant 28 : index
    %34 = vector.load %arg1[%c0_41, %c28] : memref<8x256xbf16, #tpu.memory_space<vmem>>, vector<8x128xbf16>
    %cst_42 = arith.constant dense<0.000000e+00> : vector<8x128xf32>
    %35 = tpu.matmul %34, %0, %cst_42 {dimension_numbers = #tpu.dot_dimension_numbers<[1], [0], [0], [1], [0, 0, 1, 1], [], []>} : vector<8x128xbf16>, vector<128x128xbf16>, vector<8x128xf32> -> vector<8x128xf32>
    %c0_43 = arith.constant 0 : index
    %c0_44 = arith.constant 0 : index
    %36 = vector.load %arg4[%c0_43, %c0_44] : memref<8x128xf32, #tpu.memory_space<vmem>>, vector<8x128xf32>
    %37 = arith.maximumf %36, %35 : vector<8x128xf32>
    %c0_45 = arith.constant 0 : index
    %c0_46 = arith.constant 0 : index
    %38 = vector.load %arg4[%c0_45, %c0_46] : memref<8x128xf32, #tpu.memory_space<vmem>>, vector<8x128xf32>
    tpu.vector_store %arg4[%c0_45, %c0_46], %37 {strides = array<i32>} : memref<8x128xf32, #tpu.memory_space<vmem>>, vector<8x128xf32>,
    %c0_47 = arith.constant 0 : index
    %c32 = arith.constant 32 : index
    %39 = vector.load %arg1[%c0_47, %c32] : memref<8x256xbf16, #tpu.memory_space<vmem>>, vector<8x128xbf16>
    %cst_48 = arith.constant dense<0.000000e+00> : vector<8x128xf32>
    %40 = tpu.matmul %39, %0, %cst_48 {dimension_numbers = #tpu.dot_dimension_numbers<[1], [0], [0], [1], [0, 0, 1, 1], [], []>} : vector<8x128xbf16>, vector<128x128xbf16>, vector<8x128xf32> -> vector<8x128xf32>
    %c0_49 = arith.constant 0 : index
    %c0_50 = arith.constant 0 : index
    %41 = vector.load %arg4[%c0_49, %c0_50] : memref<8x128xf32, #tpu.memory_space<vmem>>, vector<8x128xf32>
    %42 = arith.maximumf %41, %40 : vector<8x128xf32>
    %c0_51 = arith.constant 0 : index
    %c0_52 = arith.constant 0 : index
    %43 = vector.load %arg4[%c0_51, %c0_52] : memref<8x128xf32, #tpu.memory_space<vmem>>, vector<8x128xf32>
    tpu.vector_store %arg4[%c0_51, %c0_52], %42 {strides = array<i32>} : memref<8x128xf32, #tpu.memory_space<vmem>>, vector<8x128xf32>,
    %c0_53 = arith.constant 0 : index
    %c36 = arith.constant 36 : index
    %44 = vector.load %arg1[%c0_53, %c36] : memref<8x256xbf16, #tpu.memory_space<vmem>>, vector<8x128xbf16>
    %cst_54 = arith.constant dense<0.000000e+00> : vector<8x128xf32>
    %45 = tpu.matmul %44, %0, %cst_54 {dimension_numbers = #tpu.dot_dimension_numbers<[1], [0], [0], [1], [0, 0, 1, 1], [], []>} : vector<8x128xbf16>, vector<128x128xbf16>, vector<8x128xf32> -> vector<8x128xf32>
    %c0_55 = arith.constant 0 : index
    %c0_56 = arith.constant 0 : index
    %46 = vector.load %arg4[%c0_55, %c0_56] : memref<8x128xf32, #tpu.memory_space<vmem>>, vector<8x128xf32>
    %47 = arith.maximumf %46, %45 : vector<8x128xf32>
    %c0_57 = arith.constant 0 : index
    %c0_58 = arith.constant 0 : index
    %48 = vector.load %arg4[%c0_57, %c0_58] : memref<8x128xf32, #tpu.memory_space<vmem>>, vector<8x128xf32>
    tpu.vector_store %arg4[%c0_57, %c0_58], %47 {strides = array<i32>} : memref<8x128xf32, #tpu.memory_space<vmem>>, vector<8x128xf32>,
    %c0_59 = arith.constant 0 : index
    %c40 = arith.constant 40 : index
    %49 = vector.load %arg1[%c0_59, %c40] : memref<8x256xbf16, #tpu.memory_space<vmem>>, vector<8x128xbf16>
    %cst_60 = arith.constant dense<0.000000e+00> : vector<8x128xf32>
    %50 = tpu.matmul %49, %0, %cst_60 {dimension_numbers = #tpu.dot_dimension_numbers<[1], [0], [0], [1], [0, 0, 1, 1], [], []>} : vector<8x128xbf16>, vector<128x128xbf16>, vector<8x128xf32> -> vector<8x128xf32>
    %c0_61 = arith.constant 0 : index
    %c0_62 = arith.constant 0 : index
    %51 = vector.load %arg4[%c0_61, %c0_62] : memref<8x128xf32, #tpu.memory_space<vmem>>, vector<8x128xf32>
    %52 = arith.maximumf %51, %50 : vector<8x128xf32>
    %c0_63 = arith.constant 0 : index
    %c0_64 = arith.constant 0 : index
    %53 = vector.load %arg4[%c0_63, %c0_64] : memref<8x128xf32, #tpu.memory_space<vmem>>, vector<8x128xf32>
    tpu.vector_store %arg4[%c0_63, %c0_64], %52 {strides = array<i32>} : memref<8x128xf32, #tpu.memory_space<vmem>>, vector<8x128xf32>,
    %c0_65 = arith.constant 0 : index
    %c44 = arith.constant 44 : index
    %54 = vector.load %arg1[%c0_65, %c44] : memref<8x256xbf16, #tpu.memory_space<vmem>>, vector<8x128xbf16>
    %cst_66 = arith.constant dense<0.000000e+00> : vector<8x128xf32>
    %55 = tpu.matmul %54, %0, %cst_66 {dimension_numbers = #tpu.dot_dimension_numbers<[1], [0], [0], [1], [0, 0, 1, 1], [], []>} : vector<8x128xbf16>, vector<128x128xbf16>, vector<8x128xf32> -> vector<8x128xf32>
    %c0_67 = arith.constant 0 : index
    %c0_68 = arith.constant 0 : index
    %56 = vector.load %arg4[%c0_67, %c0_68] : memref<8x128xf32, #tpu.memory_space<vmem>>, vector<8x128xf32>
    %57 = arith.maximumf %56, %55 : vector<8x128xf32>
    %c0_69 = arith.constant 0 : index
    %c0_70 = arith.constant 0 : index
    %58 = vector.load %arg4[%c0_69, %c0_70] : memref<8x128xf32, #tpu.memory_space<vmem>>, vector<8x128xf32>
    tpu.vector_store %arg4[%c0_69, %c0_70], %57 {strides = array<i32>} : memref<8x128xf32, #tpu.memory_space<vmem>>, vector<8x128xf32>,
    %c0_71 = arith.constant 0 : index
    %c0_72 = arith.constant 0 : index
    %59 = vector.load %arg4[%c0_71, %c0_72] : memref<8x128xf32, #tpu.memory_space<vmem>>, vector<8x128xf32>
    %c0_73 = arith.constant 0 : index
    %c0_74 = arith.constant 0 : index
    %60 = vector.load %arg3[%c0_73, %c0_74] : memref<1x128xf32, #tpu.memory_space<vmem>>, vector<1x128xf32>
    %61 = vector.broadcast %60 : vector<1x128xf32> to vector<8x128xf32>
    %62 = arith.addf %59, %61 : vector<8x128xf32>
    %cst_75 = arith.constant 0.000000e+00 : f32
    %63 = vector.broadcast %cst_75 : f32 to vector<8x128xf32>
    %64 = arith.maximumf %62, %63 : vector<8x128xf32>
    %c0_76 = arith.constant 0 : index
    %c0_77 = arith.constant 0 : index
    %65 = vector.load %arg4[%c0_76, %c0_77] : memref<8x128xf32, #tpu.memory_space<vmem>>, vector<8x128xf32>
    tpu.vector_store %arg4[%c0_76, %c0_77], %64 {strides = array<i32>} : memref<8x128xf32, #tpu.memory_space<vmem>>, vector<8x128xf32>,
    return
  }
  func.func @transform_0(%arg0: i32) -> (i32, i32) {
    %c0_i32 = arith.constant 0 : i32
    %c0_i32_0 = arith.constant 0 : i32
    return %arg0, %c0_i32 : i32, i32
  }
  func.func @transform_1(%arg0: i32) -> (i32, i32) {
    %c0_i32 = arith.constant 0 : i32
    %c0_i32_0 = arith.constant 0 : i32
    %c0_i32_1 = arith.constant 0 : i32
    return %c0_i32, %c0_i32_0 : i32, i32
  }
  func.func @transform_2(%arg0: i32) -> (i32, i32) {
    %c0_i32 = arith.constant 0 : i32
    %c0_i32_0 = arith.constant 0 : i32
    %c0_i32_1 = arith.constant 0 : i32
    return %c0_i32, %c0_i32_0 : i32, i32
  }
  func.func @transform_3(%arg0: i32) -> (i32, i32) {
    %c0_i32 = arith.constant 0 : i32
    %c0_i32_0 = arith.constant 0 : i32
    return %arg0, %c0_i32 : i32, i32
  }
}

</mosaic_0001>

<bundles_post_ra>
// kernel: tpu_custom_call.1
= control target key start
LH: loop header
LB: loop body
LE: loop exit
PB: predicated region body
PF: predicated region fallthrough
CT: control target
= control target key end

     0   :  { %8 = vsyncpa [#allocation3], 0  ;;  %s790_s0 = inlined_call_operand.hbm [shape: bf16[8,256], index: 0, kind: input, shape index: {}]   ;;  %s791_s1 = inlined_call_operand.hbm [shape: bf16[128,128], index: 1, kind: input, shape index: {}]   ;;  %s792_s2 = inlined_call_operand.vmem [shape: f32[1,128], index: 2, kind: input, shape index: {}]   ;;  %s793_s3 = inlined_call_operand.hbm [shape: f32[8,128], index: 3, kind: output, shape index: {}]  }
   0x1   :  { %9 = vsyncpa [#allocation6], 0 }
   0x2   :  { %10 = vsyncpa [#allocation4], 0  ;;  %s16_s14 = sshll.u32 %s790_s0, 4  ;;  %s604_s15 = smov [#allocation2]   ;;  %s17_s14 = int_to_ptr.hbm [resolvable:$true] %s16_s14 }
   0x3   :  { %s18_s16 = sshll.u32 %s604_s15, 4  ;;  %s26_s19 = sshll.u32 %s791_s1, 4  ;;  %s19_s16 = int_to_ptr.vmem [resolvable:$true] %s18_s16  ;;  %s27_s19 = int_to_ptr.hbm [resolvable:$true] %s26_s19 }
   0x4   :  { %21 = dma.hbm_to_vmem [thread:$0]  %s17_s14, 128, %s19_s16, [#allocation3]  }
   0x5   :  { %s605_s20 = smov [#allocation5]   ;;  %s606_s22 = smov 64  }
   0x6   :  { %s28_s21 = sshll.u32 %s605_s20, 4  ;;  %s607_s23 = smov 4   ;;  %s29_s21 = int_to_ptr.vmem [resolvable:$true] %s28_s21 }
   0x7   :  { %34 = dma.hbm_to_vmem [thread:$0]  %s27_s19, 1024, %s29_s21, [#allocation6], %s606_s22, %s606_s22, %s607_s23  }
   0x8   :  { %598 = dma.done.wait [#allocation3], 128  }
   0x9   :  { %599 = vsyncadd [#allocation3], 4294967168 }
   0xa   :  { %600 = dma.done.wait [#allocation6], 1024  }
   0xb   :  { %601 = vsyncadd [#allocation6], 4294966272  ;;  %v153_v0 = vld [vmem:[#allocation2] sm:$0xff]  ;;  %s608_s0 = smov 120   ;;  %s609_s1 = smov 124   ;;  %v659_v6 = vld [vmem:[#allocation5 + $0x30] sm:$0xff] }
   0xc   :  { %v155_v1 = vunpack.c.l.b16 %v153_v0  ;;  %v156_v3 = vunpack.c.h.b16 %v153_v0  ;;  %s610_s24 = smov 116   ;;  %v655_v5 = vld [vmem:[#allocation5 + $0x38] sm:$0xff]  ;;  %s611_s25 = smov 112   ;;  %v670_v7 = vld [vmem:[#allocation5 + $0x28] sm:$0xff]  ;;  %v674_v8 = vld [vmem:[#allocation5 + $0x20] sm:$0xff]  ;;  %vm192_vm0 = vcmask 949248  }
   0xd   :  { %110 = vmatpush.bf16.msra.mxu0 %v655_v5  ;;  %195 = vmatpush.bf16.msra.mxu3 %v655_v5  ;;  %s612_s26 = smov 108   ;;  %v680_v9 = vld [vmem:[#allocation5 + $0x18] sm:$0xff]  ;;  %s613_s27 = smov 104   ;;  %v689_v10 = vld [vmem:[#allocation5 + $0x10] sm:$0xff]  ;;  %v695_v11 = vld [vmem:[#allocation5 + $0x8] sm:$0xff]  ;;  %vm134_vm1 = vcmask 1014784  }
   0xe   :  { %v646_v2 = vpack.c.b16 %v155_v1, %v155_v1  ;;  %v651_v4 = vpack.c.b16 %v156_v3, %v156_v3  ;;  %137 = vmatpush.bf16.msra.mxu1 %v655_v5  ;;  %166 = vmatpush.bf16.msra.mxu2 %v655_v5  ;;  %s614_s28 = smov 100   ;;  %s615_s29 = smov 96   ;;  %v704_v12 = vld [vmem:[#allocation5] sm:$0xff]  ;;  %v61_v13 = vld [vmem:[#allocation2] sm:$0xf]  ;;  %vm163_vm2 = vcmask 982016  }
   0xf   :  { %s616_s30 = smov 92   ;;  %s617_s4 = smov 88   ;;  %vm221_vm3 = vcmask 916480   ;;  %vm250_vm4 = vcmask 883712   ;;  %vm279_vm5 = vcmask 850944   ;;  %vm308_vm6 = vcmask 818176  }
  0x10   :  { %159 = vrot.lane.b32.xlu1 %v646_v2, %s608_s0  ;;  %130 = vrot.lane.b32.xlu0 %v646_v2, %s609_s1  ;;  %s618_s5 = smov 84   ;;  %vm337_vm7 = vcmask 785408   ;;  %vm366_vm8 = vcmask 752640   ;;  %vm395_vm9 = vcmask 719872   ;;  %vm424_vm10 = vcmask 687104   ;;  %s619_s8 = smov [#allocation7]  }
  0x11   :  { %188 = vrot.lane.b32.xlu2 %v646_v2, %s610_s24  ;;  %111 = vmatpush.bf16.msra.mxu0 %v659_v6  ;;  %s456_s9 = sshll.u32 %s619_s8, 4  ;;  %s458_s12 = sshll.u32 %s793_s3, 4  ;;  %s457_s9 = int_to_ptr.vmem [resolvable:$true] %s456_s9  ;;  %s459_s12 = int_to_ptr.hbm [resolvable:$true] %s458_s12 }
  0x12   :  { %196 = vmatpush.bf16.msra.mxu3 %v659_v6  ;;  %138 = vmatpush.bf16.msra.mxu1 %v659_v6 }
  0x13   :  { %167 = vmatpush.bf16.msra.mxu2 %v659_v6 }
  0x15   :  { %112 = vmatpush.bf16.msra.mxu0 %v670_v7 }
  0x16   :  { %197 = vmatpush.bf16.msra.mxu3 %v670_v7  ;;  %139 = vmatpush.bf16.msra.mxu1 %v670_v7 }
  0x17   :  { %168 = vmatpush.bf16.msra.mxu2 %v670_v7 }
  0x18   :  { %161 = vrot.lane.b32.xlu1 %v651_v4, %s608_s0  ;;  %132 = vrot.lane.b32.xlu0 %v651_v4, %s609_s1 }
  0x19   :  { %190 = vrot.lane.b32.xlu2 %v651_v4, %s610_s24  ;;  %113 = vmatpush.bf16.msra.mxu0 %v674_v8 }
  0x1a   :  { %198 = vmatpush.bf16.msra.mxu3 %v674_v8  ;;  %140 = vmatpush.bf16.msra.mxu1 %v674_v8 }
  0x1b   :  { %169 = vmatpush.bf16.msra.mxu2 %v674_v8 }
  0x1d   :  { %114 = vmatpush.bf16.msra.mxu0 %v680_v9 }
  0x1e   :  { %199 = vmatpush.bf16.msra.mxu3 %v680_v9  ;;  %141 = vmatpush.bf16.msra.mxu1 %v680_v9 }
  0x1f   :  { %170 = vmatpush.bf16.msra.mxu2 %v680_v9 }
  0x20   :  { %217 = vrot.lane.b32.xlu0 %v646_v2, %s611_s25  ;;  %219 = vrot.lane.b32.xlu1 %v651_v4, %s611_s25 }
  0x21   :  { %246 = vrot.lane.b32.xlu2 %v646_v2, %s612_s26  ;;  %115 = vmatpush.bf16.msra.mxu0 %v689_v10 }
  0x22   :  { %200 = vmatpush.bf16.msra.mxu3 %v689_v10  ;;  %142 = vmatpush.bf16.msra.mxu1 %v689_v10 }
  0x23   :  { %171 = vmatpush.bf16.msra.mxu2 %v689_v10 }
  0x25   :  { %116 = vmatpush.bf16.msra.mxu0 %v695_v11 }
  0x26   :  { %201 = vmatpush.bf16.msra.mxu3 %v695_v11  ;;  %143 = vmatpush.bf16.msra.mxu1 %v695_v11 }
  0x27   :  { %172 = vmatpush.bf16.msra.mxu2 %v695_v11 }
  0x28   :  { %248 = vrot.lane.b32.xlu0 %v651_v4, %s612_s26  ;;  %275 = vrot.lane.b32.xlu1 %v646_v2, %s613_s27 }
  0x29   :  { %277 = vrot.lane.b32.xlu2 %v651_v4, %s613_s27  ;;  %117 = vmatpush.bf16.msra.mxu0 %v704_v12 }
  0x2a   :  { %202 = vmatpush.bf16.msra.mxu3 %v704_v12  ;;  %144 = vmatpush.bf16.msra.mxu1 %v704_v12 }
  0x2b   :  { %173 = vmatpush.bf16.msra.mxu2 %v704_v12 }
  0x2c   :  { %118 = vmatmul.bf16.vlgmr.msra.gmra.mxu0 %v61_v13 }
  0x2d   :  { %224 = vmatpush.bf16.msrb.mxu0 %v655_v5 }
  0x2e   :  { %253 = vmatpush.bf16.msrb.mxu1 %v655_v5  ;;  %311 = vmatpush.bf16.msrb.mxu3 %v655_v5 }
  0x2f   :  { %282 = vmatpush.bf16.msrb.mxu2 %v655_v5 }
  0x30   :  { %306 = vrot.lane.b32.xlu1 %v651_v4, %s614_s28  ;;  %304 = vrot.lane.b32.xlu0 %v646_v2, %s614_s28 }
  0x31   :  { %333 = vrot.lane.b32.xlu2 %v646_v2, %s615_s29  ;;  %225 = vmatpush.bf16.msrb.mxu0 %v659_v6 }
  0x32   :  { %254 = vmatpush.bf16.msrb.mxu1 %v659_v6  ;;  %312 = vmatpush.bf16.msrb.mxu3 %v659_v6 }
  0x33   :  { %283 = vmatpush.bf16.msrb.mxu2 %v659_v6 }
  0x35   :  { %226 = vmatpush.bf16.msrb.mxu0 %v670_v7 }
  0x36   :  { %255 = vmatpush.bf16.msrb.mxu1 %v670_v7  ;;  %313 = vmatpush.bf16.msrb.mxu3 %v670_v7 }
  0x37   :  { %284 = vmatpush.bf16.msrb.mxu2 %v670_v7 }
  0x38   :  { %335 = vrot.lane.b32.xlu0 %v651_v4, %s615_s29  ;;  %362 = vrot.lane.b32.xlu1 %v646_v2, %s616_s30 }
  0x39   :  { %364 = vrot.lane.b32.xlu2 %v651_v4, %s616_s30  ;;  %227 = vmatpush.bf16.msrb.mxu0 %v674_v8 }
  0x3a   :  { %256 = vmatpush.bf16.msrb.mxu1 %v674_v8  ;;  %314 = vmatpush.bf16.msrb.mxu3 %v674_v8 }
  0x3b   :  { %285 = vmatpush.bf16.msrb.mxu2 %v674_v8 }
  0x3d   :  { %228 = vmatpush.bf16.msrb.mxu0 %v680_v9 }
  0x3e   :  { %257 = vmatpush.bf16.msrb.mxu1 %v680_v9  ;;  %315 = vmatpush.bf16.msrb.mxu3 %v680_v9 }
  0x3f   :  { %286 = vmatpush.bf16.msrb.mxu2 %v680_v9 }
  0x40   :  { %393 = vrot.lane.b32.xlu1 %v651_v4, %s617_s4  ;;  %391 = vrot.lane.b32.xlu0 %v646_v2, %s617_s4 }
  0x41   :  { %420 = vrot.lane.b32.xlu2 %v646_v2, %s618_s5  ;;  %229 = vmatpush.bf16.msrb.mxu0 %v689_v10 }
  0x42   :  { %258 = vmatpush.bf16.msrb.mxu1 %v689_v10  ;;  %316 = vmatpush.bf16.msrb.mxu3 %v689_v10 }
  0x43   :  { %287 = vmatpush.bf16.msrb.mxu2 %v689_v10 }
  0x45   :  { %230 = vmatpush.bf16.msrb.mxu0 %v695_v11 }
  0x46   :  { %259 = vmatpush.bf16.msrb.mxu1 %v695_v11  ;;  %317 = vmatpush.bf16.msrb.mxu3 %v695_v11 }
  0x47   :  { %288 = vmatpush.bf16.msrb.mxu2 %v695_v11 }
  0x48   :  { %422 = vrot.lane.b32.xlu0 %v651_v4, %s618_s5 }
  0x49   :  { %231 = vmatpush.bf16.msrb.mxu0 %v704_v12 }
  0x4a   :  { %260 = vmatpush.bf16.msrb.mxu1 %v704_v12  ;;  %318 = vmatpush.bf16.msrb.mxu3 %v704_v12 }
  0x4b   :  { %289 = vmatpush.bf16.msrb.mxu2 %v704_v12 }
  0x4d   :  { %340 = vmatpush.bf16.msra.mxu0 %v655_v5 }
  0x51   :  { %341 = vmatpush.bf16.msra.mxu0 %v659_v6 }
  0x55   :  { %342 = vmatpush.bf16.msra.mxu0 %v670_v7 }
  0x59   :  { %343 = vmatpush.bf16.msra.mxu0 %v674_v8 }
  0x5d   :  { %344 = vmatpush.bf16.msra.mxu0 %v680_v9 }
  0x61   :  { %345 = vmatpush.bf16.msra.mxu0 %v689_v10 }
  0x65   :  { %346 = vmatpush.bf16.msra.mxu0 %v695_v11 }
  0x69   :  { %347 = vmatpush.bf16.msra.mxu0 %v704_v12 }
  0x6b   :  { %v189_v14 = vpop.permute.xlu2 %188 }
  0x73   :  { %v191_v15 = vpop.permute.xlu2 %190 }
  0x74   :  { %v193_v16 = vsel %vm192_vm0, %v189_v14, %v191_v15  ;;  %v525_v14 = vld [vmem:[%s792_s2] ss:$0 sm:$0xff] }
  0x75   :  { %203 = vmatmul.bf16.vlgmr.msra.gmra.mxu3 %v193_v16 }
  0x76   :  { %427 = vmatpush.bf16.msra.mxu3 %v655_v5 }
  0x7a   :  { %428 = vmatpush.bf16.msra.mxu3 %v659_v6 }
  0x7b   :  { %v247_v19 = vpop.permute.xlu2 %246 }
  0x7e   :  { %429 = vmatpush.bf16.msra.mxu3 %v670_v7 }
  0x82   :  { %v160_v17 = vpop.permute.xlu1 %159  ;;  %v131_v18 = vpop.permute.xlu0 %130  ;;  %430 = vmatpush.bf16.msra.mxu3 %v674_v8 }
  0x83   :  { %v278_v27 = vpop.permute.xlu2 %277 }
  0x86   :  { %431 = vmatpush.bf16.msra.mxu3 %v680_v9 }
  0x8a   :  { %v162_v20 = vpop.permute.xlu1 %161  ;;  %v133_v21 = vpop.permute.xlu0 %132  ;;  %432 = vmatpush.bf16.msra.mxu3 %v689_v10 }
  0x8b   :  { %v135_v22 = vsel %vm134_vm1, %v131_v18, %v133_v21  ;;  %v164_v23 = vsel %vm163_vm2, %v160_v17, %v162_v20  ;;  %v334_v32 = vpop.permute.xlu2 %333 }
  0x8c   :  { %145 = vmatmul.bf16.vlgmr.msra.gmra.mxu1 %v135_v22  ;;  %174 = vmatmul.bf16.vlgmr.msra.gmra.mxu2 %v164_v23 }
  0x8d   :  { %369 = vmatpush.bf16.msra.mxu1 %v655_v5  ;;  %398 = vmatpush.bf16.msra.mxu2 %v655_v5 }
  0x8e   :  { %433 = vmatpush.bf16.msra.mxu3 %v695_v11 }
  0x91   :  { %370 = vmatpush.bf16.msra.mxu1 %v659_v6  ;;  %399 = vmatpush.bf16.msra.mxu2 %v659_v6 }
  0x92   :  { %v218_v24 = vpop.permute.xlu0 %217  ;;  %v220_v25 = vpop.permute.xlu1 %219  ;;  %434 = vmatpush.bf16.msra.mxu3 %v704_v12 }
  0x93   :  { %v222_v26 = vsel %vm221_vm3, %v218_v24, %v220_v25  ;;  %v365_v36 = vpop.permute.xlu2 %364 }
  0x94   :  { %232 = vmatmul.bf16.vlgmr.msrb.gmra.mxu0 %v222_v26 }
  0x95   :  { %371 = vmatpush.bf16.msra.mxu1 %v670_v7  ;;  %400 = vmatpush.bf16.msra.mxu2 %v670_v7 }
  0x99   :  { %372 = vmatpush.bf16.msra.mxu1 %v674_v8  ;;  %401 = vmatpush.bf16.msra.mxu2 %v674_v8 }
  0x9a   :  { %v249_v28 = vpop.permute.xlu0 %248  ;;  %v276_v29 = vpop.permute.xlu1 %275 }
  0x9b   :  { %v251_v30 = vsel %vm250_vm4, %v247_v19, %v249_v28  ;;  %v280_v31 = vsel %vm279_vm5, %v276_v29, %v278_v27  ;;  %v421_v45 = vpop.permute.xlu2 %420 }
  0x9c   :  { %261 = vmatmul.bf16.vlgmr.msrb.gmra.mxu1 %v251_v30  ;;  %290 = vmatmul.bf16.vlgmr.msrb.gmra.mxu2 %v280_v31 }
  0x9d   :  { %373 = vmatpush.bf16.msra.mxu1 %v680_v9  ;;  %402 = vmatpush.bf16.msra.mxu2 %v680_v9 }
  0xa1   :  { %374 = vmatpush.bf16.msra.mxu1 %v689_v10  ;;  %403 = vmatpush.bf16.msra.mxu2 %v689_v10 }
  0xa2   :  { %v307_v33 = vpop.permute.xlu1 %306  ;;  %v305_v34 = vpop.permute.xlu0 %304 }
  0xa3   :  { %v309_v35 = vsel %vm308_vm6, %v305_v34, %v307_v33 }
  0xa4   :  { %319 = vmatmul.bf16.vlgmr.msrb.gmra.mxu3 %v309_v35 }
  0xa5   :  { %375 = vmatpush.bf16.msra.mxu1 %v695_v11  ;;  %404 = vmatpush.bf16.msra.mxu2 %v695_v11 }
  0xa9   :  { %376 = vmatpush.bf16.msra.mxu1 %v704_v12  ;;  %405 = vmatpush.bf16.msra.mxu2 %v704_v12  ;;  %v119_v44 = vpop.f32.mrf.mxu0 }
  0xaa   :  { %v336_v37 = vpop.permute.xlu0 %335  ;;  %v363_v38 = vpop.permute.xlu1 %362 }
  0xab   :  { %v338_v39 = vsel %vm337_vm7, %v334_v32, %v336_v37  ;;  %v367_v40 = vsel %vm366_vm8, %v363_v38, %v365_v36 }
  0xac   :  { %348 = vmatmul.bf16.vlgmr.msra.gmra.mxu0 %v338_v39  ;;  %377 = vmatmul.bf16.vlgmr.msra.gmra.mxu1 %v367_v40 }
  0xb1   :  { %v121_v48 = vpop.f32.mrf.mxu0 }
  0xb2   :  { %v394_v41 = vpop.permute.xlu1 %393  ;;  %v392_v42 = vpop.permute.xlu0 %391 }
  0xb3   :  { %v396_v43 = vsel %vm395_vm9, %v392_v42, %v394_v41 }
  0xb4   :  { %406 = vmatmul.bf16.vlgmr.msra.gmra.mxu2 %v396_v43 }
  0xba   :  { %v423_v46 = vpop.permute.xlu0 %422 }
  0xbb   :  { %v425_v47 = vsel %vm424_vm10, %v421_v45, %v423_v46 }
  0xbc   :  { %435 = vmatmul.bf16.vlgmr.msra.gmra.mxu3 %v425_v47 }
  0xf8   :  { %v204_v49 = vpop.f32.mrf.mxu3 }
 0x100   :  { %v206_v50 = vpop.f32.mrf.mxu3 }
 0x109   :  { %v146_v51 = vpop.f32.mrf.mxu1 }
 0x10a   :  { %v151_v60 = vmax.f32 %v119_v44, %v146_v51 }
 0x10f   :  { %v175_v52 = vpop.f32.mrf.mxu2 }
 0x110   :  { %v180_v61 = vmax.f32 %v151_v60, %v175_v52 }
 0x111   :  { %v148_v53 = vpop.f32.mrf.mxu1  ;;  %v233_v54 = vpop.f32.mrf.mxu0 }
 0x112   :  { %v209_v2 = vmax.f32 %v180_v61, %v204_v49 }
 0x114   :  { %v238_v3 = vmax.f32 %v209_v2, %v233_v54 }
 0x117   :  { %v177_v55 = vpop.f32.mrf.mxu2 }
 0x119   :  { %v262_v56 = vpop.f32.mrf.mxu1  ;;  %v235_v57 = vpop.f32.mrf.mxu0 }
 0x11a   :  { %v267_v5 = vmax.f32 %v238_v3, %v262_v56 }
 0x11f   :  { %v291_v58 = vpop.f32.mrf.mxu2 }
 0x120   :  { %v296_v8 = vmax.f32 %v267_v5, %v291_v58 }
 0x121   :  { %v264_v59 = vpop.f32.mrf.mxu1 }
 0x127   :  { %v293_v62 = vpop.f32.mrf.mxu2  ;;  %v320_v63 = vpop.f32.mrf.mxu3 }
 0x128   :  { %v325_v9 = vmax.f32 %v296_v8, %v320_v63 }
 0x129   :  { %v349_v0 = vpop.f32.mrf.mxu0  ;;  %v378_v1 = vpop.f32.mrf.mxu1 }
 0x12a   :  { %v354_v11 = vmax.f32 %v325_v9, %v349_v0 }
 0x12c   :  { %v383_v12 = vmax.f32 %v354_v11, %v378_v1 }
 0x12f   :  { %v322_v4 = vpop.f32.mrf.mxu3 }
 0x131   :  { %v351_v6 = vpop.f32.mrf.mxu0  ;;  %v380_v7 = vpop.f32.mrf.mxu1 }
 0x137   :  { %v407_v10 = vpop.f32.mrf.mxu2 }
 0x138   :  { %v412_v13 = vmax.f32 %v383_v12, %v407_v10 }
 0x13f   :  { %v409_v15 = vpop.f32.mrf.mxu2  ;;  %v436_v16 = vpop.f32.mrf.mxu3 }
 0x140   :  { %v441_v17 = vmax.f32 %v412_v13, %v436_v16 }
 0x142   :  { %v448_v18 = vadd.f32 %v525_v14, %v441_v17 }
 0x144   :  { %v449_v19 = vmax.f32 %v448_v18, 0.0 }
 0x146   :  { %450 = vst [vmem:[#allocation7] sm:$0xff] %v449_v19 }
 0x147   :  { %v438_v20 = vpop.f32.mrf.mxu3  ;;  %461 = dma.vmem_to_hbm [thread:$0]  %s457_s9, 128, %s459_s12, [#allocation4]  }
 0x148   :  { %602 = dma.done.wait [#allocation4], 128  }
 0x149   :  { %603 = vsyncadd [#allocation4], 4294967168 }
 0x14a   :  { %466 = vsyncpa [#allocation3], 1 }
 0x14b   :  { %467 = vsyncpa [#allocation6], 1 }
 0x14c   :  { %468 = vsyncpa [#allocation4], 1 }

</bundles_post_ra>
